<compile_context>
chip_gen: v6e
topology: v6e:2x2x1
jax: 0.10.0
libtpu: 0.0.40
codegen_flags: <defaults>
</compile_context>

<pallas_src>
import numpy as np
import jax
import jax.numpy as jnp
from jax.experimental import pallas as pl
from jax.experimental.pallas import tpu as pltpu

_LANE = 128


# --------------------------------------------------------------------------- #
# Kernels
# --------------------------------------------------------------------------- #
def _lift_kernel_single_k(s_ref, x_ref, o_ref):
    """K fits one block: a single MXU matmul per output tile, no accumulation."""
    o_ref[...] = jnp.dot(
        s_ref[...], x_ref[...], preferred_element_type=jnp.float32
    ).astype(o_ref.dtype)


def _lift_kernel_multi_k_f32(s_ref, x_ref, o_ref):
    """K tiled, f32 output: accumulate directly into the k-resident output block."""
    k = pl.program_id(3)

    @pl.when(k == 0)
    def _():
        o_ref[...] = jnp.zeros_like(o_ref)

    o_ref[...] += jnp.dot(s_ref[...], x_ref[...], preferred_element_type=jnp.float32)


def _lift_kernel_multi_k_acc(s_ref, x_ref, o_ref, acc_ref):
    """K tiled, narrow output dtype: f32 VMEM accumulator, cast on the last k step."""
    k = pl.program_id(3)

    @pl.when(k == 0)
    def _():
        acc_ref[...] = jnp.zeros_like(acc_ref)

    acc_ref[...] += jnp.dot(s_ref[...], x_ref[...], preferred_element_type=jnp.float32)

    @pl.when(k == pl.num_programs(3) - 1)
    def _():
        o_ref[...] = acc_ref[...].astype(o_ref.dtype)


# --------------------------------------------------------------------------- #
# Tiling / VMEM helpers
# --------------------------------------------------------------------------- #
def _round_up(x, m):
    return ((x + m - 1) // m) * m


def _vmem_capacity_bytes():
    try:
        info = pltpu.get_tpu_info()
        for name in ("vmem_capacity_bytes", "vmem_bytes", "vmem_size_bytes"):
            v = getattr(info, name, None)
            if v:
                return int(v)
    except Exception:
        pass
    return 64 << 20  # conservative fallback: v7x per-TensorCore VMEM


def _pick_tile(dim, max_tile):
    """Pick (tile, padded_dim) for one dimension.

    Either the full, unpadded dim as a single block (no padding, no copy), or a
    128-multiple tile minimizing (grid steps, padded size).
    """
    dim = int(dim)
    if dim <= max_tile:
        return dim, dim
    max_tile = max(int(max_tile), _LANE)
    best = None  # (steps, padded, tile)
    t = _LANE
    while t <= max_tile:
        steps = -(-dim // t)
        padded = steps * t
        if best is None or (steps, padded) < (best[0], best[1]):
            best = (steps, padded, t)
        t += _LANE
    return int(best[2]), int(best[1])


def _select_tiling(N, F, K, s_is, x_is, o_is, out_dtype, vmem_cap, B,
                   max_tn=None, max_tf=None, max_tk=None):
    max_tn = int(max_tn) if max_tn else 4096
    max_tf = int(max_tf) if max_tf else 1024
    max_tk = int(max_tk) if max_tk else 2048

    # K: full-dim block when it fits (no padding of the contraction dim).
    TK, K_pad = _pick_tile(K, max_tk)
    # F: full dim when it fits, else lane-dense 128-multiple tiles.
    TF, F_pad = _pick_tile(F, max_tf)

    # Shrink the (K, F) X block if it alone would blow the VMEM budget.
    while 2 * TK * TF * x_is > vmem_cap // 2 and (TF > _LANE or TK > _LANE):
        if TF >= TK and TF > _LANE:
            max_tf = max(_LANE, TF // 2)
            TF, F_pad = _pick_tile(F, max_tf)
        else:
            max_tk = max(_LANE, TK // 2)
            TK, K_pad = _pick_tile(K, max_tk)

    multi_k = K_pad > TK
    use_acc = multi_k and (np.dtype(out_dtype) != np.dtype(jnp.float32))

    # N: give the remaining VMEM budget to the output's sublane dim.
    per_tn = 2 * TK * s_is + 2 * TF * o_is + (4 * TF if use_acc else 0)
    fixed = 2 * TK * TF * x_is
    budget = max(_LANE, (vmem_cap - fixed) // max(per_tn, 1))
    max_tn = min(max_tn, max(_LANE, (budget // _LANE) * _LANE))
    TN, N_pad = _pick_tile(N, max_tn)

    # v7x megacore: ensure >=2 blocks on a parallel axis when B == 1
    # (only when it costs no extra padding; free on single-core parts).
    if B == 1 and N_pad == TN and F_pad == TF:
        if TN % 256 == 0:
            TN //= 2
        elif TF % 256 == 0:
            TF //= 2

    return TN, TF, TK, N_pad, F_pad, K_pad, multi_k, use_acc


def _pad_to(a, shape):
    if tuple(a.shape) == tuple(shape):
        return a
    return jnp.pad(a, [(0, t - s) for s, t in zip(a.shape, shape)])


# --------------------------------------------------------------------------- #
# Tiled, batched lift matmul:  out[b] = s_nk[b] @ x_pool[b]
# --------------------------------------------------------------------------- #
def _lift_matmul(s_nk, x_pool, *, out_dtype=None,
                 max_tn=None, max_tf=None, max_tk=None):
    """s_nk: (B, N, K), x_pool: (B, K, F) -> (B, N, F)."""
    B, N, K = s_nk.shape
    Bx, Kx, F = x_pool.shape
    assert (Bx, Kx) == (B, K), (s_nk.shape, x_pool.shape)
    out_dtype = np.dtype(out_dtype if out_dtype is not None else x_pool.dtype)

    s_is = np.dtype(s_nk.dtype).itemsize
    x_is = np.dtype(x_pool.dtype).itemsize
    o_is = out_dtype.itemsize

    vmem_cap = max((_vmem_capacity_bytes() * 5) // 8, 16 << 20)
    TN, TF, TK, N_pad, F_pad, K_pad, multi_k, use_acc = _select_tiling(
        N, F, K, s_is, x_is, o_is, out_dtype, vmem_cap, B,
        max_tn=max_tn, max_tf=max_tf, max_tk=max_tk)

    # Zero-pad only the dims that actually grew (usually none). Zeros along K
    # contribute nothing to the sum; N/F overhang is sliced off the output.
    s_p = _pad_to(s_nk, (B, N_pad, K_pad))
    x_p = _pad_to(x_pool, (B, K_pad, F_pad))

    Nt, Ft, Kt = N_pad // TN, F_pad // TF, K_pad // TK

    # Grid order: keep the operand whose re-reads would cost more resident in
    # VMEM (Pallas skips the DMA when the block index repeats between steps;
    # with Kt == 1 the non-streamed operand stays resident for the whole sweep).
    extra_if_x_resident = (Ft - 1) * N_pad * K_pad * s_is   # S re-read per F tile
    extra_if_s_resident = (Nt - 1) * K_pad * F_pad * x_is   # X re-read per N tile
    x_resident = extra_if_x_resident <= extra_if_s_resident

    if x_resident:
        grid = (B, Ft, Nt, Kt)
        s_map = lambda b, f, n, k: (b, n, k)
        x_map = lambda b, f, n, k: (b, k, f)
        o_map = lambda b, f, n, k: (b, n, f)
    else:
        grid = (B, Nt, Ft, Kt)
        s_map = lambda b, n, f, k: (b, n, k)
        x_map = lambda b, n, f, k: (b, k, f)
        o_map = lambda b, n, f, k: (b, n, f)

    if not multi_k:
        kernel, scratch = _lift_kernel_single_k, []
    elif not use_acc:
        kernel, scratch = _lift_kernel_multi_k_f32, []
    else:
        kernel, scratch = _lift_kernel_multi_k_acc, [pltpu.VMEM((TN, TF), jnp.float32)]

    est_vmem = (2 * (TN * TK * s_is + TK * TF * x_is) + 2 * TN * TF * o_is
                + (TN * TF * 4 if use_acc else 0))
    vmem_limit = int(min(vmem_cap, max(2 * est_vmem, 32 << 20)))

    cost = pl.CostEstimate(
        flops=int(2 * B * N_pad * F_pad * K_pad),
        transcendentals=0,
        bytes_accessed=int(B * (N_pad * K_pad * s_is + K_pad * F_pad * x_is
                                + N_pad * F_pad * o_is)),
    )

    out = pl.pallas_call(
        kernel,
        out_shape=jax.ShapeDtypeStruct((B, N_pad, F_pad), out_dtype),
        grid_spec=pltpu.PrefetchScalarGridSpec(
            num_scalar_prefetch=0,
            grid=grid,
            in_specs=[pl.BlockSpec((None, TN, TK), s_map),
                      pl.BlockSpec((None, TK, TF), x_map)],
            out_specs=pl.BlockSpec((None, TN, TF), o_map),
            scratch_shapes=scratch,
        ),
        compiler_params=pltpu.CompilerParams(
            dimension_semantics=("parallel", "parallel", "parallel", "arbitrary"),
            vmem_limit_bytes=vmem_limit,
        ),
        cost_estimate=cost,
    )(s_p, x_p)

    if (N_pad, F_pad) != (N, F):
        out = out[:, :N, :F]
    return out


# --------------------------------------------------------------------------- #
# BaseLift.forward (dense path)
# --------------------------------------------------------------------------- #
def base_lift_forward(x_pool, s=None, s_inv=None, matrix_op="precomputed",
                      reduce_op="sum", compute_dtype=None,
                      s_compute_dtype=None, x_compute_dtype=None):
    """JAX/Pallas equivalent of BaseLift.forward for dense tensors.

    x_pool : (K, F) or (B, K, F)   pooled supernode features
    s      : (N, K) or (B, N, K)   assignment matrix (SelectOutput.s)
    s_inv  : (K, N) or (B, K, N)   precomputed inverse assignment (SelectOutput.s_inv)

    reduce_op is accepted for API parity only: the dense path is a matmul and
    therefore exactly the 'sum' semantics (the PyTorch dense branch likewise
    ignores reduce_op).  Sparse torch_sparse lifts with 'mean'/'max' are NOT
    implemented here.

    compute_dtype / s_compute_dtype / x_compute_dtype: optional lower-precision
    input dtypes (e.g. jnp.bfloat16) to halve HBM traffic on bandwidth-bound
    parts (recommended on v5e); accumulation is always f32 and the output keeps
    x_pool's original dtype.  Use x_compute_dtype alone to keep a possibly
    ill-conditioned lift matrix in f32.

    returns: (N, F) or (B, N, F)
    """
    squeeze_batch = (x_pool.ndim == 2)
    if squeeze_batch:
        x_pool = x_pool[None]
        s = None if s is None else s[None]
        s_inv = None if s_inv is None else s_inv[None]

    out_dtype = x_pool.dtype

    if matrix_op == "precomputed":
        # One-time HBM transpose of S_inv (K,N)->(N,K) so the kernel always runs
        # the canonical (TN,TK)x(TK,TF) MXU orientation (no per-tile XLU
        # transposes of the S tile inside the grid loop).
        s_nk = jnp.swapaxes(s_inv, -1, -2)
    elif matrix_op == "transpose":
        s_nk = s                                            # already (B, N, K)
    elif matrix_op == "inverse":
        # Moore-Penrose pseudoinverse kept in f32 regardless of compute_dtype.
        s_nk = jnp.swapaxes(jnp.linalg.pinv(s.astype(jnp.float32)), -1, -2)
    else:
        raise RuntimeError(
            f"'matrix_op' must be one of ('precomputed', 'transpose', 'inverse') "
            f"({matrix_op} given)")

    s_dt = s_compute_dtype if s_compute_dtype is not None else compute_dtype
    x_dt = x_compute_dtype if x_compute_dtype is not None else compute_dtype
    if s_dt is not None:
        s_nk = s_nk.astype(s_dt)
    if x_dt is not None:
        x_pool = x_pool.astype(x_dt)

    out = _lift_matmul(s_nk, x_pool, out_dtype=out_dtype)
    return out[0] if squeeze_batch else out


# --------------------------------------------------------------------------- #
# Self-test
# --------------------------------------------------------------------------- #
if __name__ == "__main__":
    key = jax.random.PRNGKey(0)
    k1, k2, k3, k4, k5 = jax.random.split(key, 5)

    # Small shapes consistent with BaseLift: B=2 graphs, K=8 supernodes,
    # N=16 original nodes, F=32 features.
    B, K, N, F = 2, 8, 16, 32
    x_pool = jax.random.normal(k1, (B, K, F), dtype=jnp.float32)
    s_inv = jax.random.normal(k2, (B, K, N), dtype=jnp.float32)   # (B, K, N)
    s = jax.random.normal(k3, (B, N, K), dtype=jnp.float32)       # (B, N, K)

    # default BaseLift(): matrix_op='precomputed', reduce_op='sum'
    out_pre = jax.block_until_ready(
        base_lift_forward(x_pool, s_inv=s_inv, matrix_op="precomputed"))
    ref_pre = jnp.einsum("bkn,bkf->bnf", s_inv, x_pool, precision="highest")
    assert out_pre.shape == (B, N, F)
    assert jnp.allclose(out_pre, ref_pre, atol=1e-4, rtol=1e-4)

    # matrix_op='transpose'
    out_tr = jax.block_until_ready(
        base_lift_forward(x_pool, s=s, matrix_op="transpose"))
    ref_tr = jnp.einsum("bnk,bkf->bnf", s, x_pool, precision="highest")
    assert jnp.allclose(out_tr, ref_tr, atol=1e-4, rtol=1e-4)

    # matrix_op='inverse'
    out_inv = jax.block_until_ready(
        base_lift_forward(x_pool, s=s, matrix_op="inverse"))
    ref_inv = jnp.einsum("bnk,bkf->bnf",
                         jnp.swapaxes(jnp.linalg.pinv(s), -1, -2), x_pool,
                         precision="highest")
    assert jnp.allclose(out_inv, ref_inv, atol=1e-3, rtol=1e-3)

    # unbatched (2-D) path
    out_2d = jax.block_until_ready(
        base_lift_forward(x_pool[0], s_inv=s_inv[0], matrix_op="precomputed"))
    assert out_2d.shape == (N, F)
    assert jnp.allclose(out_2d, ref_pre[0], atol=1e-4, rtol=1e-4)

    # Forced multi-tile / multi-K path (exercises N,K padding, output slicing
    # and accumulation into the k-resident f32 output block).
    Nb, Kb, Fb = 200, 160, 96
    xb = jax.random.normal(k4, (1, Kb, Fb), dtype=jnp.float32)
    sb = jax.random.normal(k5, (1, Nb, Kb), dtype=jnp.float32)
    ref_big = jnp.einsum("bnk,bkf->bnf", sb, xb, precision="highest")
    out_big = jax.block_until_ready(
        _lift_matmul(sb, xb, max_tn=128, max_tf=128, max_tk=128))
    assert out_big.shape == (1, Nb, Fb)
    assert jnp.allclose(out_big, ref_big, atol=5e-3, rtol=5e-3)

    # Multi-K with a narrow output dtype -> f32 scratch accumulator path.
    out_big_bf16 = jax.block_until_ready(
        _lift_matmul(sb, xb, out_dtype=jnp.bfloat16,
                     max_tn=128, max_tf=128, max_tk=128))
    assert jnp.allclose(out_big_bf16.astype(jnp.float32), ref_big,
                        atol=0.5, rtol=3e-2)

    # bf16 compute path (memory-bound lever, recommended on v5e); f32 accumulation.
    out_bf16 = jax.block_until_ready(
        base_lift_forward(x_pool, s_inv=s_inv, matrix_op="precomputed",
                          compute_dtype=jnp.bfloat16))
    assert jnp.allclose(out_bf16, ref_pre, atol=2e-1, rtol=5e-2)

    # Mixed precision: keep S in f32 (conditioning), cast only X to bf16.
    out_mix = jax.block_until_ready(
        base_lift_forward(x_pool, s_inv=s_inv, matrix_op="precomputed",
                          x_compute_dtype=jnp.bfloat16))
    assert jnp.allclose(out_mix, ref_pre, atol=2e-1, rtol=5e-2)

    print("KERNEL_OK")
</pallas_src>

<mosaic_0001>
module attributes {stable_mosaic.version = 11 : i64} {
  func.func @_lift_kernel_single_k(%arg0: i32, %arg1: i32, %arg2: i32, %arg3: i32, %arg4: memref<1x16x8xf32, #tpu.memory_space<vmem>>, %arg5: memref<1x8x32xf32, #tpu.memory_space<vmem>>, %arg6: memref<1x16x32xf32, #tpu.memory_space<vmem>>) attributes {dimension_semantics = [#tpu.dimension_semantics<parallel>, #tpu.dimension_semantics<parallel>, #tpu.dimension_semantics<parallel>, #tpu.dimension_semantics<arbitrary>], iteration_bounds = array<i64: 2, 1, 1, 1>, scalar_prefetch = 0 : i64, scratch_operands = 0 : i64, tpu.core_type = #tpu.core_type<tc>, window_params = [{transform_indices = @transform_0, window_bounds = array<i64: 1, 16, 8>}, {transform_indices = @transform_1, window_bounds = array<i64: 1, 8, 32>}, {transform_indices = @transform_2, window_bounds = array<i64: 1, 16, 32>}]} {
    %c0 = arith.constant 0 : index
    %c0_0 = arith.constant 0 : index
    %c0_1 = arith.constant 0 : index
    %0 = vector.load %arg4[%c0, %c0_0, %c0_1] : memref<1x16x8xf32, #tpu.memory_space<vmem>>, vector<1x16x8xf32>
    %1 = vector.shape_cast %0 : vector<1x16x8xf32> to vector<16x8xf32>
    %c0_2 = arith.constant 0 : index
    %c0_3 = arith.constant 0 : index
    %c0_4 = arith.constant 0 : index
    %2 = vector.load %arg5[%c0_2, %c0_3, %c0_4] : memref<1x8x32xf32, #tpu.memory_space<vmem>>, vector<1x8x32xf32>
    %3 = vector.shape_cast %2 : vector<1x8x32xf32> to vector<8x32xf32>
    %cst = arith.constant dense<0.000000e+00> : vector<16x32xf32>
    %4 = tpu.matmul %1, %3, %cst {dimension_numbers = #tpu.dot_dimension_numbers<[1], [0], [0], [1], [0, 0, 1, 1], [], []>} : vector<16x8xf32>, vector<8x32xf32>, vector<16x32xf32> -> vector<16x32xf32>
    %c0_5 = arith.constant 0 : index
    %c0_6 = arith.constant 0 : index
    %c0_7 = arith.constant 0 : index
    %5 = vector.load %arg6[%c0_5, %c0_6, %c0_7] : memref<1x16x32xf32, #tpu.memory_space<vmem>>, vector<1x16x32xf32>
    %6 = vector.shape_cast %5 : vector<1x16x32xf32> to vector<16x32xf32>
    %7 = vector.shape_cast %4 : vector<16x32xf32> to vector<1x16x32xf32>
    tpu.vector_store %arg6[%c0_5, %c0_6, %c0_7], %7 {strides = array<i32>} : memref<1x16x32xf32, #tpu.memory_space<vmem>>, vector<1x16x32xf32>,
    return
  }
  func.func @transform_0(%arg0: i32, %arg1: i32, %arg2: i32, %arg3: i32) -> (i32, i32, i32) {
    %c0_i32 = arith.constant 0 : i32
    return %arg0, %arg2, %arg3 : i32, i32, i32
  }
  func.func @transform_1(%arg0: i32, %arg1: i32, %arg2: i32, %arg3: i32) -> (i32, i32, i32) {
    %c0_i32 = arith.constant 0 : i32
    return %arg0, %arg3, %arg1 : i32, i32, i32
  }
  func.func @transform_2(%arg0: i32, %arg1: i32, %arg2: i32, %arg3: i32) -> (i32, i32, i32) {
    %c0_i32 = arith.constant 0 : i32
    return %arg0, %arg2, %arg1 : i32, i32, i32
  }
}

</mosaic_0001>

<bundles_post_ra>
// kernel: tpu_custom_call.1
= control target key start
LH: loop header
LB: loop body
LE: loop exit
PB: predicated region body
PF: predicated region fallthrough
CT: control target
= control target key end

     0   :  { %7 = vsyncpa [#allocation3], 0  ;;  %s747_s0 = inlined_call_operand.vmem [shape: f32[2,16,8], index: 0, kind: input, shape index: {}]   ;;  %s748_s1 = inlined_call_operand.vmem [shape: f32[2,8,32], index: 1, kind: input, shape index: {}]   ;;  %s749_s2 = inlined_call_operand.hbm [shape: f32[2,16,32], index: 2, kind: output, shape index: {}]  }
   0x1   :  { %9 = vsyncpa [#allocation3 + $0x1], 0  ;;  %s630_s9 = smov 0   ;;  %s632_s10 = smov 0  }
   0x2   :  { %s634_s11 = smov 0   ;;  %s636_s12 = smov 0  }
   0x3   :  { %s638_s13 = smov 0   ;;  %s640_s14 = smov 0  }
   0x4 LB: > { %s451_s15 = sadd.s32 4294967295, %s610_s14   ;;  %s452_s16 = sadd.s32 4294967294, %s610_s14   ;;  %s610_s14 = sphi %s640_s14, %s15_s14   ;;  %s606_s13 = sphi %s638_s13, %s756_s13   ;;  %s602_s12 = sphi %s636_s12, %s755_s12   ;;  %s598_s11 = sphi %s634_s11, %s754_s11   ;;  %s594_s10 = sphi %s632_s10, %s753_s10   ;;  %s590_s9 = sphi %s630_s9, %s752_s9  }
   0x5   : > { %s41_s17 = sadd.s32 1, %s606_s13  ;;  %s112_s18 = sadd.s32 1, %s598_s11 }
   0x6   : > { %p43_p0 = scmp.ge.s32.totalorder %s41_s17, 2  ;;  %p122_p1 = scmp.ne.s32.totalorder %s598_s11, %s594_s10 }
   0x7   : > { %p123_p2 = scmp.eq.s32.totalorder %s451_s15, 1  ;;  %p128_p3 = scmp.ne.s32.totalorder %s594_s10, %s590_s9 }
   0x8   : > { %s758_s17 = smov (%p43_p0, %s41_s17), 0  ;;  %p129_p5 = scmp.eq.s32.totalorder %s452_s16, 1 }
   0x9   : > { %p670_p4 = por %p123_p2, %p122_p1  ;;  %s105_s20 = ssub.s32 %s606_s13, %s758_s17 }
   0xa   : > { %p455_p6 = scmp.ge.s32.totalorder %s610_s14, 1  ;;  %p110_p7 = scmp.eq.s32.totalorder %s105_s20, 0 }
   0xb   : > { %p677_p8 = por %p129_p5, %p128_p3  ;;  %p176_p9 = scmp.lt.s32.totalorder %s610_s14, 3 }
   0xc   : > { %s683_s22 = scalar_select %p110_p7, %s598_s11, %s112_s18  }
   0xd   : > { %p177_p10 = pnand %p455_p6, %p176_p9 }
   0xe   : > { %p216_p11 = scmp.lt.s32.totalorder (!%p177_p10), %s602_s12, 1  ;;  %s212_s4 = sand.u32 (!%p177_p10), 1, %s594_s10  }
   0xf   : > { %180 = sbr.rel (%p177_p10) target bundleno = 236 (0xec), region = 28  ;;  %s456_s5 = sshll.u32 (!%p177_p10), %s212_s4, 4 }
  0x10   : > { %s214_s6 = scalar_lea.vmem (!%p177_p10), [#allocation2], %s456_s5  ;;  %s468_s8 = sshll.u32 (!%p177_p10), %s602_s12, 8 }
  0x11   : > { %s344_s7 = sshll.u32 (!%p177_p10), %s214_s6, 4  ;;  %s700_s18 = scalar_lea.hbm (!%p177_p10), %s749_s2, %s468_s8  ;;  %s695_s7 = int_to_ptr.vmem [resolvable:$true] %s344_s7 }
  0x12   : > { %s702_s20 = scalar_lea.sflag (!%p177_p10), [#allocation3], %s212_s4 }
  0x14   : > { %s217_s23 = scalar_select %p216_p11, %s602_s12, 1  ;;  %vm242_vm0 = vcmask 64512   ;;  %vm324_vm1 = vcmask 261120  }
  0x15   : > { %s612_s12 = smov [#allocation2]  }
  0x16   : > { %s459_s24 = sshll.u32 %s217_s23, 3  ;;  %s467_s25 = sshll.u32 %s217_s23, 4 }
  0x17   : > { %s237_s28 = scalar_lea.vmem %s748_s1, %s459_s24  ;;  %s226_s3 = scalar_lea.vmem %s747_s0, %s467_s25 }
  0x18   : > { %v241_v0 = vld [vmem:[%s237_s28] sm:$0xff]  ;;  %v240_v2 = vld [vmem:[%s226_s3 + $0x8] sm:$0xff]  ;;  %s534_s23 = scalar_lea.vmem %s695_s7, 256  ;;  %s538_s24 = sshll.u32 %s612_s12, 4  ;;  %s539_s24 = int_to_ptr.vmem [resolvable:$false] %s538_s24 }
  0x19   : > { %v239_v1 = vld [vmem:[%s226_s3] sm:$0xff]  ;;  %472 = vmatprep.subr.mxu0 %v241_v0  ;;  %p535_p12 = scmp.ne.s32.totalorder %s695_s7, %s534_s23  ;;  %s540_s25 = scalar_lea.vmem %s539_s24, 512 }
  0x1a   : > { %474 = vmatprep.mubr.msk.f32.mxu0 %vm242_vm0, %v239_v1  ;;  %473 = vmatpush3.msra.mxu0 %v241_v0  ;;  %p541_p1 = scmp.lt.s32.totalorder %s695_s7, %s539_s24  ;;  %p542_p2 = scmp.lt.s32.totalorder %s540_s25, %s534_s23 }
  0x1b   : > { %475 = vmatmul.mubr.msk.f32.vlgmr.msra.gmra.mxu0 %vm242_vm0, %v240_v2  ;;  %p536_p13 = pnand %p535_p12, %p670_p4 }
  0x1c   : > { %p543_p3 = por %p542_p2, %p541_p1 }
  0x1d   : > { %p537_p0 = pneg %p536_p13 }
  0x1f   : > { %p544_p5 = pnand %p543_p3, %p537_p0 }
  0xdb   : > { %v476_v3 = vpop.f32.mrf.mxu0 }
  0xdc   : > { %326 = vst.msk [vmem:[%s214_s6 + $0x8] sm:$0xff] %vm324_vm1, %v476_v3 }
  0xdd   : > { %v315_v4 = vpop.f32.mrf.mxu0 }
  0xde   : > { %325 = vst.msk [vmem:[%s214_s6] sm:$0xff] %vm324_vm1, %v315_v4 }
  0xdf   : > { %547 = shalt.err (!%p544_p5)
}
  0xe0   : > { %s548_s26 = scalar_lea.hbm %s700_s18, 256  ;;  %s552_s29 = scalar_lea.hbm %s749_s2, 512 }
  0xe1   : > { %p549_p6 = scmp.ne.s32.totalorder %s700_s18, %s548_s26  ;;  %p553_p10 = scmp.lt.s32.totalorder %s700_s18, %s749_s2 }
  0xe2   : > { %p554_p11 = scmp.lt.s32.totalorder %s552_s29, %s548_s26 }
  0xe3   : > { %p550_p7 = pnand %p549_p6, %p670_p4 }
  0xe4   : > { %p555_p12 = por %p554_p11, %p553_p10 }
  0xe5   : > { %p551_p9 = pneg %p550_p7 }
  0xe7   : > { %p556_p13 = pnand %p555_p12, %p551_p9 }
  0xe9   : > { %559 = shalt.err (!%p556_p13)
}
  0xea   : > { %s613_s4 = smov 128   ;;  %s614_s5 = smov 8  }
  0xeb   : > { %477 = dma.vmem_to_hbm [thread:$0]  (%p670_p4), %s695_s7, 256, %s700_s18, %s702_s20, %s613_s4, %s613_s4, %s614_s5  }
  0xec PF: > { %p483_p0 = scmp.ge.s32.totalorder %s610_s14, 2  ;;  %s359_s6 = sand.u32 1, %s590_s9  }
  0xed   : > { %s360_s8 = scalar_lea.sflag [#allocation3], %s359_s6 }
  0xee   : > { %p480_p1 = pnand %p483_p0, %p677_p8 }
  0xf0   : > { %p481_p2 = pneg %p480_p1 }
  0xf2   : > { %585 = dma.done.wait (%p481_p2), %s360_s8, 256  }
  0xf3   : > { %587 = vsyncadd (%p481_p2), %s360_s8, 4294967040  ;;  %s15_s14 = sadd.s32 1, %s610_s14   ;;  %s752_s9 = smov %s594_s10 }
  0xf4   : > { %p12_p3 = scmp.ge.s32.totalorder %s15_s14, 4   ;;  %s753_s10 = smov %s598_s11 }
  0xf5   : > { %s754_s11 = smov %s683_s22  ;;  %s755_s12 = smov %s606_s13 }
  0xf6   : > { %s756_s13 = smov %s758_s17  ;;  %14 = sbr.rel (!%p12_p3) target bundleno = 4 (0x4), region = 66 }
  0xfb   :  { %365 = vsyncpa [#allocation3], 1 }
  0xfc   :  { %367 = vsyncpa [#allocation3 + $0x1], 1 }

</bundles_post_ra>
